<compile_context>
chip_gen: v5e
topology: v5e:2x2
jax: 0.10.0
libtpu: 0.0.40
codegen_flags: <defaults>
</compile_context>

<pallas_src>
import functools

import jax
import jax.numpy as jnp
from jax.experimental import pallas as pl
from jax.experimental.pallas import tpu as pltpu


# --------------------------------------------------------------------------
# Planning helpers (all static Python, evaluated once per shape config).
# --------------------------------------------------------------------------
def _round_up(a, b):
    return ((a + b - 1) // b) * b


def _largest_divisor_leq(n, cap):
    for d in range(min(n, cap), 0, -1):
        if n % d == 0:
            return d
    return 1


def _vmem_capacity_bytes():
    """Physical VMEM per core; conservative fallback if the query fails."""
    try:
        info = pltpu.get_tpu_info()
        cap = getattr(info, "vmem_capacity_bytes", None)
        if cap:
            return int(cap)
    except Exception:
        pass
    return 64 * 1024 * 1024  # v7x-sized fallback (smallest current generation)


def make_plan(B, Cin, Cout, H, W):
    """Static tiling plan shared by weight preparation and the forward pass."""
    Wf = W // 2 + 1
    F = H * Wf
    f128 = _round_up(F, 128)

    # Multiple batches per grid step (amortize per-step overhead).
    Bt = _largest_divisor_leq(B, 8)

    # Generation-aware VMEM budget: ~70% of physical VMEM, capped at 100 MiB
    # (=> ~44 MiB on v7x, ~90 MiB on v5e/v6e).
    vmem_cap = _vmem_capacity_bytes()
    budget = int(min(vmem_cap * 0.70, 100 * 1024 * 1024))

    # Double-buffered working-set bytes per unit of TF (x, w, out blocks).
    bytes_per_tf = 4 * 2 * (Bt * 2 * Cin + Cin * 2 * Cout + Bt * 2 * Cout)
    tf_budget = max(128, budget // max(bytes_per_tf, 1))
    # vreg-pressure guard: 2 * Cout * TF * 4B of live f32 accumulator <= ~128 KiB.
    tf_vreg = max(128, (128 * 1024) // (8 * Cout))

    TF = min(f128, tf_budget, tf_vreg)
    TF = max(128, (TF // 128) * 128)          # lane-dense, multiple of 128
    F_pad = _round_up(F, TF)

    return dict(
        B=B, Cin=Cin, Cout=Cout, H=H, W=W, Wf=Wf, F=F,
        Bt=Bt, TF=TF, F_pad=F_pad,
        n_f=F_pad // TF, n_b=B // Bt,
        vmem_limit_bytes=budget,
    )


def prepare_spectral_weights(w_real, w_imag, plan):
    """One-time (parameter-init time) weight layout: (Cin, 2*Cout, F_pad).

    Rows [:Cout] hold the real plane, rows [Cout:] the imaginary plane, with
    the two frequency axes flattened into one lane-dense axis and zero-padded
    to a multiple of the frequency tile.
    """
    Cin, Cout, F, F_pad = plan["Cin"], plan["Cout"], plan["F"], plan["F_pad"]
    wr = w_real.astype(jnp.float32).reshape(Cin, Cout, F)
    wi = w_imag.astype(jnp.float32).reshape(Cin, Cout, F)
    w = jnp.concatenate([wr, wi], axis=1)               # (Cin, 2*Cout, F)
    if F_pad > F:
        w = jnp.pad(w, ((0, 0), (0, 0), (0, F_pad - F)))
    return w


# --------------------------------------------------------------------------
# Pallas kernel: per-frequency complex channel mixing (VPU formulation — the
# per-mode Cin x Cout matrices are far too small for the MXU).
# --------------------------------------------------------------------------
def spectral_mix_kernel(x_ref, w_ref, o_ref):
    """out[b, o, f] = sum_i x[b, i, f] * w[i, o, f] (complex, interleaved planes).

    Block shapes:
      x_ref : (Bt, 2*Cin,  TF)   rows [:Cin] real, [Cin:] imag
      w_ref : (Cin, 2*Cout, TF)  rows [:Cout] real, [Cout:] imag
      o_ref : (Bt, 2*Cout, TF)   rows [:Cout] real, [Cout:] imag
    """
    bt, cin2, tf = x_ref.shape
    cin = cin2 // 2
    cout2 = w_ref.shape[1]
    cout = cout2 // 2

    # Bt and Cin are small static ints: fully unrolled accumulation; never
    # materializes a Cin*Cout-sized intermediate.
    for b in range(bt):
        acc_r = jnp.zeros((cout, tf), jnp.float32)
        acc_i = jnp.zeros((cout, tf), jnp.float32)
        for i in range(cin):
            xr = x_ref[b, i:i + 1, :]                    # (1, TF) -> bcast over Cout
            xi = x_ref[b, cin + i:cin + i + 1, :]
            wr = w_ref[i, 0:cout, :]                     # (Cout, TF)
            wi = w_ref[i, cout:cout2, :]
            acc_r = acc_r + (xr * wr - xi * wi)
            acc_i = acc_i + (xr * wi + xi * wr)
        # Single full-tile (8*k sublanes) unmasked store per batch row.
        o_ref[b] = jnp.concatenate([acc_r, acc_i], axis=0)


# --------------------------------------------------------------------------
# Forward pass.
# --------------------------------------------------------------------------
def spectral_block_forward(x, w_planes, plan):
    """x: (B, Cin, H, W) float32; w_planes: (Cin, 2*Cout, F_pad) float32."""
    B, Cin, H, W = x.shape
    Cout = plan["Cout"]
    Wf, F, F_pad = plan["Wf"], plan["F"], plan["F_pad"]
    TF, Bt = plan["TF"], plan["Bt"]

    # rFFT2 with 'forward' normalization (forward transform scaled by 1/(H*W)).
    x_ft = jnp.fft.rfft2(x.astype(jnp.float32), norm="forward")   # complex64
    xr = jnp.real(x_ft).reshape(B, Cin, F)
    xi = jnp.imag(x_ft).reshape(B, Cin, F)
    xp = jnp.concatenate([xr, xi], axis=1).astype(jnp.float32)    # (B, 2*Cin, F)
    if F_pad > F:
        xp = jnp.pad(xp, ((0, 0), (0, 0), (0, F_pad - F)))

    grid = (plan["n_f"], plan["n_b"])   # batch innermost -> weight tile resident

    x_spec = pl.BlockSpec((Bt, 2 * Cin, TF), lambda f, b: (b, 0, f))
    w_spec = pl.BlockSpec((Cin, 2 * Cout, TF), lambda f, b: (0, 0, f))
    o_spec = pl.BlockSpec((Bt, 2 * Cout, TF), lambda f, b: (b, 0, f))

    flops = 8 * B * Cin * Cout * F_pad
    bytes_accessed = 4 * (2 * B * Cin * F_pad        # x planes
                          + 2 * Cin * Cout * F_pad   # weight planes (resident over b)
                          + 2 * B * Cout * F_pad)    # output planes

    out = pl.pallas_call(
        spectral_mix_kernel,
        grid=grid,
        in_specs=[x_spec, w_spec],
        out_specs=o_spec,
        out_shape=jax.ShapeDtypeStruct((B, 2 * Cout, F_pad), jnp.float32),
        compiler_params=pltpu.CompilerParams(
            # Megacore shards the frequency axis (disjoint weight reads); the
            # batch axis is the sequential weight-resident loop.
            dimension_semantics=("parallel", "arbitrary"),
            vmem_limit_bytes=plan["vmem_limit_bytes"],
        ),
        cost_estimate=pl.CostEstimate(
            flops=flops, transcendentals=0, bytes_accessed=bytes_accessed),
    )(xp, w_planes)

    out_ft = (out[:, :Cout, :F] + 1j * out[:, Cout:, :F]).reshape(B, Cout, H, Wf)
    y = jnp.fft.irfft2(out_ft, s=(H, W), norm="forward")           # (B, Cout, H, W)

    # ReLU: fused by XLA into the irfft2 epilogue under jit.
    return jnp.maximum(y, 0.0).astype(jnp.float32)


def _reference(x, w_real, w_imag):
    """Pure-JAX reference for validation."""
    H, W = x.shape[-2:]
    x_ft = jnp.fft.rfft2(x, norm="forward")
    w = w_real + 1j * w_imag
    out_ft = jnp.einsum("bixy,ioxy->boxy", x_ft, w)
    y = jnp.fft.irfft2(out_ft, s=(H, W), norm="forward")
    return jnp.maximum(y, 0.0)


if __name__ == "__main__":
    B, Cin, Cout, H, W = 2, 4, 4, 16, 16
    Wf = W // 2 + 1

    key = jax.random.PRNGKey(0)
    kx, kr, ki = jax.random.split(key, 3)

    x = jax.random.normal(kx, (B, Cin, H, W), dtype=jnp.float32)

    # Deterministic "spectral" parametrization init: complex weights of shape
    # (in_channels, out_channels, H, W//2+1), scaled by 1/(Cin*Cout).
    scale = 1.0 / (Cin * Cout)
    w_real = scale * jax.random.uniform(kr, (Cin, Cout, H, Wf), dtype=jnp.float32)
    w_imag = scale * jax.random.uniform(ki, (Cin, Cout, H, Wf), dtype=jnp.float32)

    # Static tiling plan + one-time weight layout (parameter-init time, not
    # part of the per-call forward path).
    plan = make_plan(B, Cin, Cout, H, W)
    w_planes = jax.block_until_ready(prepare_spectral_weights(w_real, w_imag, plan))

    fwd = jax.jit(functools.partial(spectral_block_forward, plan=plan))
    y = jax.block_until_ready(fwd(x, w_planes))

    y_ref = jax.block_until_ready(_reference(x, w_real, w_imag))
    assert y.shape == (B, Cout, H, W)
    assert jnp.max(jnp.abs(y - y_ref)) < 1e-4

    print("KERNEL_OK")
</pallas_src>

<mosaic_0001>
module attributes {stable_mosaic.version = 11 : i64} {
  func.func @spectral_mix_kernel(%arg0: i32, %arg1: i32, %arg2: memref<2x8x256xf32, #tpu.memory_space<vmem>>, %arg3: memref<4x8x256xf32, #tpu.memory_space<vmem>>, %arg4: memref<2x8x256xf32, #tpu.memory_space<vmem>>) attributes {dimension_semantics = [#tpu.dimension_semantics<parallel>, #tpu.dimension_semantics<arbitrary>], iteration_bounds = array<i64: 1, 1>, scalar_prefetch = 0 : i64, scratch_operands = 0 : i64, tpu.core_type = #tpu.core_type<tc>, window_params = [{transform_indices = @transform_0, window_bounds = array<i64: 2, 8, 256>}, {transform_indices = @transform_1, window_bounds = array<i64: 4, 8, 256>}, {transform_indices = @transform_2, window_bounds = array<i64: 2, 8, 256>}]} {
    %cst = arith.constant 0.000000e+00 : f32
    %0 = vector.broadcast %cst : f32 to vector<4x256xf32>
    %cst_0 = arith.constant 0.000000e+00 : f32
    %1 = vector.broadcast %cst_0 : f32 to vector<4x256xf32>
    %c0 = arith.constant 0 : index
    %c0_1 = arith.constant 0 : index
    %c0_2 = arith.constant 0 : index
    %2 = vector.load %arg2[%c0, %c0_1, %c0_2] : memref<2x8x256xf32, #tpu.memory_space<vmem>>, vector<1x1x256xf32>
    %3 = vector.shape_cast %2 : vector<1x1x256xf32> to vector<1x256xf32>
    %c0_3 = arith.constant 0 : index
    %c4 = arith.constant 4 : index
    %c0_4 = arith.constant 0 : index
    %4 = vector.load %arg2[%c0_3, %c4, %c0_4] : memref<2x8x256xf32, #tpu.memory_space<vmem>>, vector<1x1x256xf32>
    %5 = vector.shape_cast %4 : vector<1x1x256xf32> to vector<1x256xf32>
    %c0_5 = arith.constant 0 : index
    %c0_6 = arith.constant 0 : index
    %c0_7 = arith.constant 0 : index
    %6 = vector.load %arg3[%c0_5, %c0_6, %c0_7] : memref<4x8x256xf32, #tpu.memory_space<vmem>>, vector<1x4x256xf32>
    %7 = vector.shape_cast %6 : vector<1x4x256xf32> to vector<4x256xf32>
    %c0_8 = arith.constant 0 : index
    %c4_9 = arith.constant 4 : index
    %c0_10 = arith.constant 0 : index
    %8 = vector.load %arg3[%c0_8, %c4_9, %c0_10] : memref<4x8x256xf32, #tpu.memory_space<vmem>>, vector<1x4x256xf32>
    %9 = vector.shape_cast %8 : vector<1x4x256xf32> to vector<4x256xf32>
    %10 = vector.broadcast %3 : vector<1x256xf32> to vector<4x256xf32>
    %11 = arith.mulf %10, %7 : vector<4x256xf32>
    %12 = vector.broadcast %5 : vector<1x256xf32> to vector<4x256xf32>
    %13 = arith.mulf %12, %9 : vector<4x256xf32>
    %14 = arith.subf %11, %13 : vector<4x256xf32>
    %15 = arith.addf %0, %14 : vector<4x256xf32>
    %16 = vector.broadcast %3 : vector<1x256xf32> to vector<4x256xf32>
    %17 = arith.mulf %16, %9 : vector<4x256xf32>
    %18 = vector.broadcast %5 : vector<1x256xf32> to vector<4x256xf32>
    %19 = arith.mulf %18, %7 : vector<4x256xf32>
    %20 = arith.addf %17, %19 : vector<4x256xf32>
    %21 = arith.addf %1, %20 : vector<4x256xf32>
    %c0_11 = arith.constant 0 : index
    %c1 = arith.constant 1 : index
    %c0_12 = arith.constant 0 : index
    %22 = vector.load %arg2[%c0_11, %c1, %c0_12] : memref<2x8x256xf32, #tpu.memory_space<vmem>>, vector<1x1x256xf32>
    %23 = vector.shape_cast %22 : vector<1x1x256xf32> to vector<1x256xf32>
    %c0_13 = arith.constant 0 : index
    %c5 = arith.constant 5 : index
    %c0_14 = arith.constant 0 : index
    %24 = vector.load %arg2[%c0_13, %c5, %c0_14] : memref<2x8x256xf32, #tpu.memory_space<vmem>>, vector<1x1x256xf32>
    %25 = vector.shape_cast %24 : vector<1x1x256xf32> to vector<1x256xf32>
    %c1_15 = arith.constant 1 : index
    %c0_16 = arith.constant 0 : index
    %c0_17 = arith.constant 0 : index
    %26 = vector.load %arg3[%c1_15, %c0_16, %c0_17] : memref<4x8x256xf32, #tpu.memory_space<vmem>>, vector<1x4x256xf32>
    %27 = vector.shape_cast %26 : vector<1x4x256xf32> to vector<4x256xf32>
    %c1_18 = arith.constant 1 : index
    %c4_19 = arith.constant 4 : index
    %c0_20 = arith.constant 0 : index
    %28 = vector.load %arg3[%c1_18, %c4_19, %c0_20] : memref<4x8x256xf32, #tpu.memory_space<vmem>>, vector<1x4x256xf32>
    %29 = vector.shape_cast %28 : vector<1x4x256xf32> to vector<4x256xf32>
    %30 = vector.broadcast %23 : vector<1x256xf32> to vector<4x256xf32>
    %31 = arith.mulf %30, %27 : vector<4x256xf32>
    %32 = vector.broadcast %25 : vector<1x256xf32> to vector<4x256xf32>
    %33 = arith.mulf %32, %29 : vector<4x256xf32>
    %34 = arith.subf %31, %33 : vector<4x256xf32>
    %35 = arith.addf %15, %34 : vector<4x256xf32>
    %36 = vector.broadcast %23 : vector<1x256xf32> to vector<4x256xf32>
    %37 = arith.mulf %36, %29 : vector<4x256xf32>
    %38 = vector.broadcast %25 : vector<1x256xf32> to vector<4x256xf32>
    %39 = arith.mulf %38, %27 : vector<4x256xf32>
    %40 = arith.addf %37, %39 : vector<4x256xf32>
    %41 = arith.addf %21, %40 : vector<4x256xf32>
    %c0_21 = arith.constant 0 : index
    %c2 = arith.constant 2 : index
    %c0_22 = arith.constant 0 : index
    %42 = vector.load %arg2[%c0_21, %c2, %c0_22] : memref<2x8x256xf32, #tpu.memory_space<vmem>>, vector<1x1x256xf32>
    %43 = vector.shape_cast %42 : vector<1x1x256xf32> to vector<1x256xf32>
    %c0_23 = arith.constant 0 : index
    %c6 = arith.constant 6 : index
    %c0_24 = arith.constant 0 : index
    %44 = vector.load %arg2[%c0_23, %c6, %c0_24] : memref<2x8x256xf32, #tpu.memory_space<vmem>>, vector<1x1x256xf32>
    %45 = vector.shape_cast %44 : vector<1x1x256xf32> to vector<1x256xf32>
    %c2_25 = arith.constant 2 : index
    %c0_26 = arith.constant 0 : index
    %c0_27 = arith.constant 0 : index
    %46 = vector.load %arg3[%c2_25, %c0_26, %c0_27] : memref<4x8x256xf32, #tpu.memory_space<vmem>>, vector<1x4x256xf32>
    %47 = vector.shape_cast %46 : vector<1x4x256xf32> to vector<4x256xf32>
    %c2_28 = arith.constant 2 : index
    %c4_29 = arith.constant 4 : index
    %c0_30 = arith.constant 0 : index
    %48 = vector.load %arg3[%c2_28, %c4_29, %c0_30] : memref<4x8x256xf32, #tpu.memory_space<vmem>>, vector<1x4x256xf32>
    %49 = vector.shape_cast %48 : vector<1x4x256xf32> to vector<4x256xf32>
    %50 = vector.broadcast %43 : vector<1x256xf32> to vector<4x256xf32>
    %51 = arith.mulf %50, %47 : vector<4x256xf32>
    %52 = vector.broadcast %45 : vector<1x256xf32> to vector<4x256xf32>
    %53 = arith.mulf %52, %49 : vector<4x256xf32>
    %54 = arith.subf %51, %53 : vector<4x256xf32>
    %55 = arith.addf %35, %54 : vector<4x256xf32>
    %56 = vector.broadcast %43 : vector<1x256xf32> to vector<4x256xf32>
    %57 = arith.mulf %56, %49 : vector<4x256xf32>
    %58 = vector.broadcast %45 : vector<1x256xf32> to vector<4x256xf32>
    %59 = arith.mulf %58, %47 : vector<4x256xf32>
    %60 = arith.addf %57, %59 : vector<4x256xf32>
    %61 = arith.addf %41, %60 : vector<4x256xf32>
    %c0_31 = arith.constant 0 : index
    %c3 = arith.constant 3 : index
    %c0_32 = arith.constant 0 : index
    %62 = vector.load %arg2[%c0_31, %c3, %c0_32] : memref<2x8x256xf32, #tpu.memory_space<vmem>>, vector<1x1x256xf32>
    %63 = vector.shape_cast %62 : vector<1x1x256xf32> to vector<1x256xf32>
    %c0_33 = arith.constant 0 : index
    %c7 = arith.constant 7 : index
    %c0_34 = arith.constant 0 : index
    %64 = vector.load %arg2[%c0_33, %c7, %c0_34] : memref<2x8x256xf32, #tpu.memory_space<vmem>>, vector<1x1x256xf32>
    %65 = vector.shape_cast %64 : vector<1x1x256xf32> to vector<1x256xf32>
    %c3_35 = arith.constant 3 : index
    %c0_36 = arith.constant 0 : index
    %c0_37 = arith.constant 0 : index
    %66 = vector.load %arg3[%c3_35, %c0_36, %c0_37] : memref<4x8x256xf32, #tpu.memory_space<vmem>>, vector<1x4x256xf32>
    %67 = vector.shape_cast %66 : vector<1x4x256xf32> to vector<4x256xf32>
    %c3_38 = arith.constant 3 : index
    %c4_39 = arith.constant 4 : index
    %c0_40 = arith.constant 0 : index
    %68 = vector.load %arg3[%c3_38, %c4_39, %c0_40] : memref<4x8x256xf32, #tpu.memory_space<vmem>>, vector<1x4x256xf32>
    %69 = vector.shape_cast %68 : vector<1x4x256xf32> to vector<4x256xf32>
    %70 = vector.broadcast %63 : vector<1x256xf32> to vector<4x256xf32>
    %71 = arith.mulf %70, %67 : vector<4x256xf32>
    %72 = vector.broadcast %65 : vector<1x256xf32> to vector<4x256xf32>
    %73 = arith.mulf %72, %69 : vector<4x256xf32>
    %74 = arith.subf %71, %73 : vector<4x256xf32>
    %75 = arith.addf %55, %74 : vector<4x256xf32>
    %76 = vector.broadcast %63 : vector<1x256xf32> to vector<4x256xf32>
    %77 = arith.mulf %76, %69 : vector<4x256xf32>
    %78 = vector.broadcast %65 : vector<1x256xf32> to vector<4x256xf32>
    %79 = arith.mulf %78, %67 : vector<4x256xf32>
    %80 = arith.addf %77, %79 : vector<4x256xf32>
    %81 = arith.addf %61, %80 : vector<4x256xf32>
    %82 = tpu.concatenate %75, %81 in 0 : vector<4x256xf32>, vector<4x256xf32> -> vector<8x256xf32>
    %c0_41 = arith.constant 0 : index
    %c0_42 = arith.constant 0 : index
    %c0_43 = arith.constant 0 : index
    %83 = vector.load %arg4[%c0_41, %c0_42, %c0_43] : memref<2x8x256xf32, #tpu.memory_space<vmem>>, vector<1x8x256xf32>
    %84 = vector.shape_cast %83 : vector<1x8x256xf32> to vector<8x256xf32>
    %85 = vector.shape_cast %82 : vector<8x256xf32> to vector<1x8x256xf32>
    tpu.vector_store %arg4[%c0_41, %c0_42, %c0_43], %85 {strides = array<i32>} : memref<2x8x256xf32, #tpu.memory_space<vmem>>, vector<1x8x256xf32>,
    %cst_44 = arith.constant 0.000000e+00 : f32
    %86 = vector.broadcast %cst_44 : f32 to vector<4x256xf32>
    %cst_45 = arith.constant 0.000000e+00 : f32
    %87 = vector.broadcast %cst_45 : f32 to vector<4x256xf32>
    %c1_46 = arith.constant 1 : index
    %c0_47 = arith.constant 0 : index
    %c0_48 = arith.constant 0 : index
    %88 = vector.load %arg2[%c1_46, %c0_47, %c0_48] : memref<2x8x256xf32, #tpu.memory_space<vmem>>, vector<1x1x256xf32>
    %89 = vector.shape_cast %88 : vector<1x1x256xf32> to vector<1x256xf32>
    %c1_49 = arith.constant 1 : index
    %c4_50 = arith.constant 4 : index
    %c0_51 = arith.constant 0 : index
    %90 = vector.load %arg2[%c1_49, %c4_50, %c0_51] : memref<2x8x256xf32, #tpu.memory_space<vmem>>, vector<1x1x256xf32>
    %91 = vector.shape_cast %90 : vector<1x1x256xf32> to vector<1x256xf32>
    %c0_52 = arith.constant 0 : index
    %c0_53 = arith.constant 0 : index
    %c0_54 = arith.constant 0 : index
    %92 = vector.load %arg3[%c0_52, %c0_53, %c0_54] : memref<4x8x256xf32, #tpu.memory_space<vmem>>, vector<1x4x256xf32>
    %93 = vector.shape_cast %92 : vector<1x4x256xf32> to vector<4x256xf32>
    %c0_55 = arith.constant 0 : index
    %c4_56 = arith.constant 4 : index
    %c0_57 = arith.constant 0 : index
    %94 = vector.load %arg3[%c0_55, %c4_56, %c0_57] : memref<4x8x256xf32, #tpu.memory_space<vmem>>, vector<1x4x256xf32>
    %95 = vector.shape_cast %94 : vector<1x4x256xf32> to vector<4x256xf32>
    %96 = vector.broadcast %89 : vector<1x256xf32> to vector<4x256xf32>
    %97 = arith.mulf %96, %93 : vector<4x256xf32>
    %98 = vector.broadcast %91 : vector<1x256xf32> to vector<4x256xf32>
    %99 = arith.mulf %98, %95 : vector<4x256xf32>
    %100 = arith.subf %97, %99 : vector<4x256xf32>
    %101 = arith.addf %86, %100 : vector<4x256xf32>
    %102 = vector.broadcast %89 : vector<1x256xf32> to vector<4x256xf32>
    %103 = arith.mulf %102, %95 : vector<4x256xf32>
    %104 = vector.broadcast %91 : vector<1x256xf32> to vector<4x256xf32>
    %105 = arith.mulf %104, %93 : vector<4x256xf32>
    %106 = arith.addf %103, %105 : vector<4x256xf32>
    %107 = arith.addf %87, %106 : vector<4x256xf32>
    %c1_58 = arith.constant 1 : index
    %c1_59 = arith.constant 1 : index
    %c0_60 = arith.constant 0 : index
    %108 = vector.load %arg2[%c1_58, %c1_59, %c0_60] : memref<2x8x256xf32, #tpu.memory_space<vmem>>, vector<1x1x256xf32>
    %109 = vector.shape_cast %108 : vector<1x1x256xf32> to vector<1x256xf32>
    %c1_61 = arith.constant 1 : index
    %c5_62 = arith.constant 5 : index
    %c0_63 = arith.constant 0 : index
    %110 = vector.load %arg2[%c1_61, %c5_62, %c0_63] : memref<2x8x256xf32, #tpu.memory_space<vmem>>, vector<1x1x256xf32>
    %111 = vector.shape_cast %110 : vector<1x1x256xf32> to vector<1x256xf32>
    %c1_64 = arith.constant 1 : index
    %c0_65 = arith.constant 0 : index
    %c0_66 = arith.constant 0 : index
    %112 = vector.load %arg3[%c1_64, %c0_65, %c0_66] : memref<4x8x256xf32, #tpu.memory_space<vmem>>, vector<1x4x256xf32>
    %113 = vector.shape_cast %112 : vector<1x4x256xf32> to vector<4x256xf32>
    %c1_67 = arith.constant 1 : index
    %c4_68 = arith.constant 4 : index
    %c0_69 = arith.constant 0 : index
    %114 = vector.load %arg3[%c1_67, %c4_68, %c0_69] : memref<4x8x256xf32, #tpu.memory_space<vmem>>, vector<1x4x256xf32>
    %115 = vector.shape_cast %114 : vector<1x4x256xf32> to vector<4x256xf32>
    %116 = vector.broadcast %109 : vector<1x256xf32> to vector<4x256xf32>
    %117 = arith.mulf %116, %113 : vector<4x256xf32>
    %118 = vector.broadcast %111 : vector<1x256xf32> to vector<4x256xf32>
    %119 = arith.mulf %118, %115 : vector<4x256xf32>
    %120 = arith.subf %117, %119 : vector<4x256xf32>
    %121 = arith.addf %101, %120 : vector<4x256xf32>
    %122 = vector.broadcast %109 : vector<1x256xf32> to vector<4x256xf32>
    %123 = arith.mulf %122, %115 : vector<4x256xf32>
    %124 = vector.broadcast %111 : vector<1x256xf32> to vector<4x256xf32>
    %125 = arith.mulf %124, %113 : vector<4x256xf32>
    %126 = arith.addf %123, %125 : vector<4x256xf32>
    %127 = arith.addf %107, %126 : vector<4x256xf32>
    %c1_70 = arith.constant 1 : index
    %c2_71 = arith.constant 2 : index
    %c0_72 = arith.constant 0 : index
    %128 = vector.load %arg2[%c1_70, %c2_71, %c0_72] : memref<2x8x256xf32, #tpu.memory_space<vmem>>, vector<1x1x256xf32>
    %129 = vector.shape_cast %128 : vector<1x1x256xf32> to vector<1x256xf32>
    %c1_73 = arith.constant 1 : index
    %c6_74 = arith.constant 6 : index
    %c0_75 = arith.constant 0 : index
    %130 = vector.load %arg2[%c1_73, %c6_74, %c0_75] : memref<2x8x256xf32, #tpu.memory_space<vmem>>, vector<1x1x256xf32>
    %131 = vector.shape_cast %130 : vector<1x1x256xf32> to vector<1x256xf32>
    %c2_76 = arith.constant 2 : index
    %c0_77 = arith.constant 0 : index
    %c0_78 = arith.constant 0 : index
    %132 = vector.load %arg3[%c2_76, %c0_77, %c0_78] : memref<4x8x256xf32, #tpu.memory_space<vmem>>, vector<1x4x256xf32>
    %133 = vector.shape_cast %132 : vector<1x4x256xf32> to vector<4x256xf32>
    %c2_79 = arith.constant 2 : index
    %c4_80 = arith.constant 4 : index
    %c0_81 = arith.constant 0 : index
    %134 = vector.load %arg3[%c2_79, %c4_80, %c0_81] : memref<4x8x256xf32, #tpu.memory_space<vmem>>, vector<1x4x256xf32>
    %135 = vector.shape_cast %134 : vector<1x4x256xf32> to vector<4x256xf32>
    %136 = vector.broadcast %129 : vector<1x256xf32> to vector<4x256xf32>
    %137 = arith.mulf %136, %133 : vector<4x256xf32>
    %138 = vector.broadcast %131 : vector<1x256xf32> to vector<4x256xf32>
    %139 = arith.mulf %138, %135 : vector<4x256xf32>
    %140 = arith.subf %137, %139 : vector<4x256xf32>
    %141 = arith.addf %121, %140 : vector<4x256xf32>
    %142 = vector.broadcast %129 : vector<1x256xf32> to vector<4x256xf32>
    %143 = arith.mulf %142, %135 : vector<4x256xf32>
    %144 = vector.broadcast %131 : vector<1x256xf32> to vector<4x256xf32>
    %145 = arith.mulf %144, %133 : vector<4x256xf32>
    %146 = arith.addf %143, %145 : vector<4x256xf32>
    %147 = arith.addf %127, %146 : vector<4x256xf32>
    %c1_82 = arith.constant 1 : index
    %c3_83 = arith.constant 3 : index
    %c0_84 = arith.constant 0 : index
    %148 = vector.load %arg2[%c1_82, %c3_83, %c0_84] : memref<2x8x256xf32, #tpu.memory_space<vmem>>, vector<1x1x256xf32>
    %149 = vector.shape_cast %148 : vector<1x1x256xf32> to vector<1x256xf32>
    %c1_85 = arith.constant 1 : index
    %c7_86 = arith.constant 7 : index
    %c0_87 = arith.constant 0 : index
    %150 = vector.load %arg2[%c1_85, %c7_86, %c0_87] : memref<2x8x256xf32, #tpu.memory_space<vmem>>, vector<1x1x256xf32>
    %151 = vector.shape_cast %150 : vector<1x1x256xf32> to vector<1x256xf32>
    %c3_88 = arith.constant 3 : index
    %c0_89 = arith.constant 0 : index
    %c0_90 = arith.constant 0 : index
    %152 = vector.load %arg3[%c3_88, %c0_89, %c0_90] : memref<4x8x256xf32, #tpu.memory_space<vmem>>, vector<1x4x256xf32>
    %153 = vector.shape_cast %152 : vector<1x4x256xf32> to vector<4x256xf32>
    %c3_91 = arith.constant 3 : index
    %c4_92 = arith.constant 4 : index
    %c0_93 = arith.constant 0 : index
    %154 = vector.load %arg3[%c3_91, %c4_92, %c0_93] : memref<4x8x256xf32, #tpu.memory_space<vmem>>, vector<1x4x256xf32>
    %155 = vector.shape_cast %154 : vector<1x4x256xf32> to vector<4x256xf32>
    %156 = vector.broadcast %149 : vector<1x256xf32> to vector<4x256xf32>
    %157 = arith.mulf %156, %153 : vector<4x256xf32>
    %158 = vector.broadcast %151 : vector<1x256xf32> to vector<4x256xf32>
    %159 = arith.mulf %158, %155 : vector<4x256xf32>
    %160 = arith.subf %157, %159 : vector<4x256xf32>
    %161 = arith.addf %141, %160 : vector<4x256xf32>
    %162 = vector.broadcast %149 : vector<1x256xf32> to vector<4x256xf32>
    %163 = arith.mulf %162, %155 : vector<4x256xf32>
    %164 = vector.broadcast %151 : vector<1x256xf32> to vector<4x256xf32>
    %165 = arith.mulf %164, %153 : vector<4x256xf32>
    %166 = arith.addf %163, %165 : vector<4x256xf32>
    %167 = arith.addf %147, %166 : vector<4x256xf32>
    %168 = tpu.concatenate %161, %167 in 0 : vector<4x256xf32>, vector<4x256xf32> -> vector<8x256xf32>
    %c1_94 = arith.constant 1 : index
    %c0_95 = arith.constant 0 : index
    %c0_96 = arith.constant 0 : index
    %169 = vector.load %arg4[%c1_94, %c0_95, %c0_96] : memref<2x8x256xf32, #tpu.memory_space<vmem>>, vector<1x8x256xf32>
    %170 = vector.shape_cast %169 : vector<1x8x256xf32> to vector<8x256xf32>
    %171 = vector.shape_cast %168 : vector<8x256xf32> to vector<1x8x256xf32>
    tpu.vector_store %arg4[%c1_94, %c0_95, %c0_96], %171 {strides = array<i32>} : memref<2x8x256xf32, #tpu.memory_space<vmem>>, vector<1x8x256xf32>,
    return
  }
  func.func @transform_0(%arg0: i32, %arg1: i32) -> (i32, i32, i32) {
    %c0_i32 = arith.constant 0 : i32
    %c0_i32_0 = arith.constant 0 : i32
    return %arg1, %c0_i32, %arg0 : i32, i32, i32
  }
  func.func @transform_1(%arg0: i32, %arg1: i32) -> (i32, i32, i32) {
    %c0_i32 = arith.constant 0 : i32
    %c0_i32_0 = arith.constant 0 : i32
    %c0_i32_1 = arith.constant 0 : i32
    return %c0_i32, %c0_i32_0, %arg0 : i32, i32, i32
  }
  func.func @transform_2(%arg0: i32, %arg1: i32) -> (i32, i32, i32) {
    %c0_i32 = arith.constant 0 : i32
    %c0_i32_0 = arith.constant 0 : i32
    return %arg1, %c0_i32, %arg0 : i32, i32, i32
  }
}

</mosaic_0001>

<bundles_post_ra>
// kernel: spectral_block_forward.1
= control target key start
LH: loop header
LB: loop body
LE: loop exit
PB: predicated region body
PF: predicated region fallthrough
CT: control target
= control target key end

     0   :  { %vm197_vm0 = vcmask 1043456   ;;  %s682_s0 = inlined_call_operand.vmem [shape: f32[2,8,256], index: 0, kind: input, shape index: {}]   ;;  %s683_s1 = inlined_call_operand.vmem [shape: f32[4,8,256], index: 1, kind: input, shape index: {}]   ;;  %s684_s2 = inlined_call_operand.vmem [shape: f32[2,8,256], index: 2, kind: output, shape index: {}]  }
   0x1   :  { %v461_v0 = vld [vmem:[%s682_s0] ss:$8 sm:$0x3]  ;;  %v466_v1 = vld [vmem:[%s682_s0 + $0x4] ss:$8 sm:$0x3] }
   0x2   :  { %v14_v2 = vld [vmem:[%s683_s1] sm:$0xf]  ;;  %v16_v3 = vld [vmem:[%s683_s1] sm:$0xf0]  ;;  %v19_v4 = vperm.slane %v461_v0, 0  ;;  %v26_v5 = vperm.slane %v466_v1, 0 }
   0x3   :  { %v479_v6 = vld [vmem:[%s682_s0 + $0x1] ss:$8 sm:$0x3]  ;;  %v484_v7 = vld [vmem:[%s682_s0 + $0x5] ss:$8 sm:$0x3] }
   0x4   :  { %v23_v8 = vmul.f32 %v19_v4, %v14_v2  ;;  %v30_v9 = vmul.f32 %v26_v5, %v16_v3  ;;  %v42_v10 = vmul.f32 %v19_v4, %v16_v3  ;;  %v44_v11 = vmul.f32 %v26_v5, %v14_v2  ;;  %v405_v12 = vld [vmem:[%s683_s1 + $0x10] sm:$0xf]  ;;  %v407_v13 = vld [vmem:[%s683_s1 + $0x10] sm:$0xf0]  ;;  %v411_v17 = vld [vmem:[%s683_s1 + $0x20] sm:$0xf] }
   0x5   :  { %v66_v14 = vperm.slane %v479_v6, 0  ;;  %v73_v15 = vperm.slane %v484_v7, 0  ;;  %v497_v16 = vld [vmem:[%s682_s0 + $0x2] ss:$8 sm:$0x3]  ;;  %v20_v18 = vperm.slane %v461_v0, 1 }
   0x6   :  { %v34_v19 = vrot.slane %v30_v9, 4  ;;  %v48_v20 = vrot.slane %v44_v11, 4  ;;  %v506_v21 = vld [vmem:[%s682_s0 + $0x6] ss:$8 sm:$0x3]  ;;  %v113_v22 = vperm.slane %v497_v16, 0 }
   0x7   :  { %v70_v23 = vmul.f32 %v405_v12, %v66_v14  ;;  %v77_v24 = vmul.f32 %v407_v13, %v73_v15  ;;  %v89_v25 = vmul.f32 %v407_v13, %v66_v14  ;;  %v91_v26 = vmul.f32 %v405_v12, %v73_v15  ;;  %v413_v27 = vld [vmem:[%s683_s1 + $0x20] sm:$0xf0]  ;;  %v515_v28 = vld [vmem:[%s682_s0 + $0x3] ss:$8 sm:$0x3] }
   0x8   :  { %v38_v29 = vsub.f32 %v23_v8, %v34_v19  ;;  %v52_v30 = vadd.f32 %v48_v20, %v42_v10  ;;  %v117_v31 = vmul.f32 %v411_v17, %v113_v22  ;;  %v120_v32 = vperm.slane %v506_v21, 0  ;;  %v521_v33 = vld [vmem:[%s682_s0 + $0x7] ss:$8 sm:$0x3]  ;;  %v417_v34 = vld [vmem:[%s683_s1 + $0x30] sm:$0xf] }
   0x9   :  { %v81_v35 = vrot.slane %v77_v24, 4  ;;  %v95_v36 = vrot.slane %v91_v26, 4  ;;  %v136_v37 = vmul.f32 %v413_v27, %v113_v22  ;;  %v419_v38 = vld [vmem:[%s683_s1 + $0x30] sm:$0xf0]  ;;  %v160_v39 = vperm.slane %v515_v28, 0 }
   0xa   :  { %v124_v40 = vmul.f32 %v413_v27, %v120_v32  ;;  %v138_v41 = vmul.f32 %v411_v17, %v120_v32  ;;  %v167_v42 = vperm.slane %v521_v33, 0  ;;  %v17_v43 = vld [vmem:[%s683_s1 + $0x8] sm:$0xf0]  ;;  %v27_v44 = vperm.slane %v466_v1, 1  ;;  %v15_v53 = vld [vmem:[%s683_s1 + $0x8] sm:$0xf] }
   0xb   :  { %v85_v45 = vsub.f32 %v70_v23, %v81_v35  ;;  %v99_v46 = vadd.f32 %v95_v36, %v89_v25  ;;  %v164_v47 = vmul.f32 %v417_v34, %v160_v39  ;;  %v183_v48 = vmul.f32 %v419_v38, %v160_v39  ;;  %v406_v8 = vld [vmem:[%s683_s1 + $0x18] sm:$0xf]  ;;  %v408_v9 = vld [vmem:[%s683_s1 + $0x18] sm:$0xf0]  ;;  %v412_v17 = vld [vmem:[%s683_s1 + $0x28] sm:$0xf] }
   0xc   :  { %v128_v49 = vrot.slane %v124_v40, 4  ;;  %v142_v50 = vrot.slane %v138_v41, 4  ;;  %v171_v51 = vmul.f32 %v419_v38, %v167_v42  ;;  %v185_v52 = vmul.f32 %v417_v34, %v167_v42  ;;  %v573_v35 = vld [vmem:[%s682_s0 + $0x14] ss:$8 sm:$0x3] }
   0xd   :  { %v87_v54 = vadd.f32 %v85_v45, %v38_v29  ;;  %v101_v55 = vadd.f32 %v99_v46, %v52_v30  ;;  %v24_v56 = vmul.f32 %v20_v18, %v15_v53  ;;  %v31_v57 = vmul.f32 %v27_v44, %v17_v43  ;;  %v418_v29 = vld [vmem:[%s683_s1 + $0x38] sm:$0xf] }
   0xe   :  { %v132_v58 = vsub.f32 %v117_v31, %v128_v49  ;;  %v146_v59 = vadd.f32 %v142_v50, %v136_v37  ;;  %v175_v60 = vrot.slane %v171_v51, 4  ;;  %v189_v61 = vrot.slane %v185_v52, 4 }
   0xf   :  { %v35_v62 = vrot.slane %v31_v57, 4  ;;  %v43_v63 = vmul.f32 %v20_v18, %v17_v43  ;;  %v45_v0 = vmul.f32 %v27_v44, %v15_v53  ;;  %v67_v1 = vperm.slane %v479_v6, 1  ;;  %v414_v18 = vld [vmem:[%s683_s1 + $0x28] sm:$0xf0]  ;;  %v206_v43 = vld [vmem:[%s683_s1] sm:$0xf] }
  0x10   :  { %v134_v2 = vadd.f32 %v132_v58, %v87_v54  ;;  %v148_v3 = vadd.f32 %v146_v59, %v101_v55  ;;  %v179_v4 = vsub.f32 %v164_v47, %v175_v60  ;;  %v193_v5 = vadd.f32 %v189_v61, %v183_v48  ;;  %v208_v44 = vld [vmem:[%s683_s1] sm:$0xf0]  ;;  %v587_v48 = vld [vmem:[%s682_s0 + $0x11] ss:$8 sm:$0x3] }
  0x11   :  { %v39_v10 = vsub.f32 %v24_v56, %v35_v62  ;;  %v49_v11 = vrot.slane %v45_v0, 4  ;;  %v71_v12 = vmul.f32 %v406_v8, %v67_v1  ;;  %v74_v13 = vperm.slane %v484_v7, 1  ;;  %v557_v7 = vld [vmem:[%s682_s0 + $0x10] ss:$8 sm:$0x3] }
  0x12   :  { %v181_v14 = vadd.f32 %v179_v4, %v134_v2  ;;  %v195_v15 = vadd.f32 %v193_v5, %v148_v3  ;;  %v90_v6 = vmul.f32 %v408_v9, %v67_v1  ;;  %v114_v19 = vperm.slane %v497_v16, 1  ;;  %v420_v16 = vld [vmem:[%s683_s1 + $0x38] sm:$0xf0]  ;;  %v597_v58 = vld [vmem:[%s682_s0 + $0x12] ss:$8 sm:$0x3] }
  0x13   :  { %v53_v20 = vadd.f32 %v49_v11, %v43_v63  ;;  %v78_v22 = vmul.f32 %v408_v9, %v74_v13  ;;  %v92_v23 = vmul.f32 %v406_v8, %v74_v13  ;;  %v121_v24 = vperm.slane %v506_v21, 1  ;;  %v592_v53 = vld [vmem:[%s682_s0 + $0x15] ss:$8 sm:$0x3]  ;;  %v425_v62 = vld [vmem:[%s683_s1 + $0x10] sm:$0xf] }
  0x14   :  { %v198_v25 = vsel %vm197_vm0, %v181_v14, %v195_v15  ;;  %v118_v26 = vmul.f32 %v412_v17, %v114_v19  ;;  %v137_v27 = vmul.f32 %v414_v18, %v114_v19  ;;  %v161_v30 = vperm.slane %v515_v28, 1  ;;  %v427_v63 = vld [vmem:[%s683_s1 + $0x10] sm:$0xf0]  ;;  %v431_v8 = vld [vmem:[%s683_s1 + $0x20] sm:$0xf] }
  0x15   :  { %200 = vst [vmem:[%s684_s2] sm:$0xff] %v198_v25  ;;  %v82_v21 = vrot.slane %v78_v22, 4  ;;  %v96_v31 = vrot.slane %v92_v23, 4  ;;  %v125_v32 = vmul.f32 %v414_v18, %v121_v24  ;;  %v139_v34 = vmul.f32 %v412_v17, %v121_v24  ;;  %v610_v5 = vld [vmem:[%s682_s0 + $0x16] ss:$8 sm:$0x3] }
  0x16   :  { %v165_v36 = vmul.f32 %v418_v29, %v161_v30  ;;  %v168_v37 = vperm.slane %v521_v33, 1  ;;  %v184_v38 = vmul.f32 %v420_v16, %v161_v30  ;;  %v211_v39 = vperm.slane %v557_v7, 0  ;;  %v619_v13 = vld [vmem:[%s682_s0 + $0x13] ss:$8 sm:$0x3] }
  0x17   :  { %v86_v28 = vsub.f32 %v71_v12, %v82_v21  ;;  %v100_v40 = vadd.f32 %v96_v31, %v90_v6  ;;  %v129_v41 = vrot.slane %v125_v32, 4  ;;  %v143_v42 = vrot.slane %v139_v34, 4  ;;  %v433_v18 = vld [vmem:[%s683_s1 + $0x20] sm:$0xf0]  ;;  %v437_v32 = vld [vmem:[%s683_s1 + $0x30] sm:$0xf] }
  0x18   :  { %v172_v45 = vmul.f32 %v420_v16, %v168_v37  ;;  %v186_v46 = vmul.f32 %v418_v29, %v168_v37  ;;  %v215_v47 = vmul.f32 %v211_v39, %v206_v43  ;;  %v218_v33 = vperm.slane %v573_v35, 0  ;;  %v627_v19 = vld [vmem:[%s682_s0 + $0x17] ss:$8 sm:$0x3] }
  0x19   :  { %v88_v49 = vadd.f32 %v86_v28, %v39_v10  ;;  %v102_v50 = vadd.f32 %v100_v40, %v53_v20  ;;  %v133_v51 = vsub.f32 %v118_v26, %v129_v41  ;;  %v147_v52 = vadd.f32 %v143_v42, %v137_v27  ;;  %v439_v29 = vld [vmem:[%s683_s1 + $0x30] sm:$0xf0] }
  0x1a   :  { %v176_v54 = vrot.slane %v172_v45, 4  ;;  %v190_v55 = vrot.slane %v186_v46, 4  ;;  %v222_v56 = vmul.f32 %v218_v33, %v208_v44  ;;  %v234_v57 = vmul.f32 %v211_v39, %v208_v44  ;;  %v209_v44 = vld [vmem:[%s683_s1 + $0x8] sm:$0xf0] }
  0x1b   :  { %v135_v59 = vadd.f32 %v133_v51, %v88_v49  ;;  %v149_v60 = vadd.f32 %v147_v52, %v102_v50  ;;  %v236_v61 = vmul.f32 %v218_v33, %v206_v43  ;;  %v257_v0 = vperm.slane %v587_v48, 0  ;;  %v207_v43 = vld [vmem:[%s683_s1 + $0x8] sm:$0xf] }
  0x1c   :  { %v180_v1 = vsub.f32 %v165_v36, %v176_v54  ;;  %v194_v2 = vadd.f32 %v190_v55, %v184_v38  ;;  %v226_v3 = vrot.slane %v222_v56, 4  ;;  %v264_v4 = vperm.slane %v592_v53, 0 }
  0x1d   :  { %v240_v9 = vrot.slane %v236_v61, 4  ;;  %v261_v10 = vmul.f32 %v425_v62, %v257_v0  ;;  %v280_v11 = vmul.f32 %v427_v63, %v257_v0  ;;  %v303_v12 = vperm.slane %v597_v58, 0  ;;  %v428_v61 = vld [vmem:[%s683_s1 + $0x18] sm:$0xf0] }
  0x1e   :  { %v182_v14 = vadd.f32 %v180_v1, %v135_v59  ;;  %v196_v15 = vadd.f32 %v194_v2, %v149_v60  ;;  %v230_v6 = vsub.f32 %v215_v47, %v226_v3  ;;  %v268_v17 = vmul.f32 %v427_v63, %v264_v4  ;;  %v426_v1 = vld [vmem:[%s683_s1 + $0x18] sm:$0xf] }
  0x1f   :  { %v244_v20 = vadd.f32 %v240_v9, %v234_v57  ;;  %v282_v22 = vmul.f32 %v425_v62, %v264_v4  ;;  %v307_v23 = vmul.f32 %v431_v8, %v303_v12  ;;  %v310_v24 = vperm.slane %v610_v5, 0 }
  0x20   :  { %v199_v25 = vsel %vm197_vm0, %v182_v14, %v196_v15  ;;  %v272_v26 = vrot.slane %v268_v17, 4  ;;  %v326_v27 = vmul.f32 %v433_v18, %v303_v12  ;;  %v349_v16 = vperm.slane %v619_v13, 0  ;;  %v434_v14 = vld [vmem:[%s683_s1 + $0x28] sm:$0xf0] }
  0x21   :  { %201 = vst [vmem:[%s684_s2 + $0x8] sm:$0xff] %v199_v25  ;;  %v286_v30 = vrot.slane %v282_v22, 4  ;;  %v314_v21 = vmul.f32 %v433_v18, %v310_v24  ;;  %v328_v31 = vmul.f32 %v431_v8, %v310_v24  ;;  %v356_v34 = vperm.slane %v627_v19, 0  ;;  %v438_v22 = vld [vmem:[%s683_s1 + $0x38] sm:$0xf] }
  0x22   :  { %v276_v36 = vsub.f32 %v261_v10, %v272_v26  ;;  %v353_v37 = vmul.f32 %v437_v32, %v349_v16  ;;  %v372_v38 = vmul.f32 %v439_v29, %v349_v16  ;;  %v212_v39 = vperm.slane %v557_v7, 1 }
  0x23   :  { %v290_v28 = vadd.f32 %v286_v30, %v280_v11  ;;  %v318_v40 = vrot.slane %v314_v21, 4  ;;  %v332_v41 = vrot.slane %v328_v31, 4  ;;  %v360_v42 = vmul.f32 %v439_v29, %v356_v34 }
  0x24   :  { %v278_v45 = vadd.f32 %v276_v36, %v230_v6  ;;  %v374_v46 = vmul.f32 %v437_v32, %v356_v34  ;;  %v216_v47 = vmul.f32 %v212_v39, %v207_v43  ;;  %v219_v33 = vperm.slane %v573_v35, 1 }
  0x25   :  { %v292_v49 = vadd.f32 %v290_v28, %v244_v20  ;;  %v322_v50 = vsub.f32 %v307_v23, %v318_v40  ;;  %v336_v7 = vadd.f32 %v332_v41, %v326_v27  ;;  %v364_v51 = vrot.slane %v360_v42, 4 }
  0x26   :  { %v378_v52 = vrot.slane %v374_v46, 4  ;;  %v223_v54 = vmul.f32 %v219_v33, %v209_v44  ;;  %v235_v55 = vmul.f32 %v212_v39, %v209_v44  ;;  %v237_v56 = vmul.f32 %v219_v33, %v207_v43 }
  0x27   :  { %v324_v57 = vadd.f32 %v322_v50, %v278_v45  ;;  %v338_v59 = vadd.f32 %v336_v7, %v292_v49  ;;  %v368_v60 = vsub.f32 %v353_v37, %v364_v51  ;;  %v258_v62 = vperm.slane %v587_v48, 1  ;;  %v432_v48 = vld [vmem:[%s683_s1 + $0x28] sm:$0xf] }
  0x28   :  { %v382_v63 = vadd.f32 %v378_v52, %v372_v38  ;;  %v227_v0 = vrot.slane %v223_v54, 4  ;;  %v241_v35 = vrot.slane %v237_v56, 4  ;;  %v265_v2 = vperm.slane %v592_v53, 1 }
  0x29   :  { %v370_v3 = vadd.f32 %v368_v60, %v324_v57  ;;  %v262_v4 = vmul.f32 %v426_v1, %v258_v62  ;;  %v304_v8 = vperm.slane %v597_v58, 1  ;;  %v281_v12 = vmul.f32 %v428_v61, %v258_v62  ;;  %v440_v58 = vld [vmem:[%s683_s1 + $0x38] sm:$0xf0] }
  0x2a   :  { %v384_v9 = vadd.f32 %v382_v63, %v338_v59  ;;  %v231_v10 = vsub.f32 %v216_v47, %v227_v0  ;;  %v269_v11 = vmul.f32 %v428_v61, %v265_v2  ;;  %v245_v15 = vadd.f32 %v241_v35, %v235_v55 }
  0x2b   :  { %v283_v6 = vmul.f32 %v426_v1, %v265_v2  ;;  %v308_v17 = vmul.f32 %v432_v48, %v304_v8  ;;  %v311_v53 = vperm.slane %v610_v5, 1  ;;  %v350_v23 = vperm.slane %v619_v13, 1 }
  0x2c   :  { %v386_v18 = vsel %vm197_vm0, %v370_v3, %v384_v9  ;;  %v273_v20 = vrot.slane %v269_v11, 4  ;;  %v357_v24 = vperm.slane %v627_v19, 1  ;;  %v327_v26 = vmul.f32 %v434_v14, %v304_v8 }
  0x2d   :  { %441 = vst [vmem:[%s684_s2 + $0x10] sm:$0xff] %v386_v18  ;;  %v287_v5 = vrot.slane %v283_v6, 4  ;;  %v315_v25 = vmul.f32 %v434_v14, %v311_v53  ;;  %v329_v27 = vmul.f32 %v432_v48, %v311_v53  ;;  %v354_v16 = vmul.f32 %v438_v22, %v350_v23 }
  0x2e   :  { %v277_v29 = vsub.f32 %v262_v4, %v273_v20  ;;  %v361_v30 = vmul.f32 %v440_v58, %v357_v24  ;;  %v373_v21 = vmul.f32 %v440_v58, %v350_v23  ;;  %v375_v36 = vmul.f32 %v438_v22, %v357_v24 }
  0x2f   :  { %v291_v31 = vadd.f32 %v287_v5, %v281_v12  ;;  %v319_v32 = vrot.slane %v315_v25, 4  ;;  %v333_v34 = vrot.slane %v329_v27, 4 }
  0x30   :  { %v279_v37 = vadd.f32 %v277_v29, %v231_v10  ;;  %v365_v13 = vrot.slane %v361_v30, 4  ;;  %v379_v28 = vrot.slane %v375_v36, 4 }
  0x31   :  { %v293_v38 = vadd.f32 %v291_v31, %v245_v15  ;;  %v323_v19 = vsub.f32 %v308_v17, %v319_v32  ;;  %v337_v39 = vadd.f32 %v333_v34, %v327_v26 }
  0x32   :  { %v369_v40 = vsub.f32 %v354_v16, %v365_v13  ;;  %v383_v43 = vadd.f32 %v379_v28, %v373_v21 }
  0x33   :  { %v325_v41 = vadd.f32 %v323_v19, %v279_v37  ;;  %v339_v42 = vadd.f32 %v337_v39, %v293_v38 }
  0x35   :  { %v371_v44 = vadd.f32 %v369_v40, %v325_v41  ;;  %v385_v45 = vadd.f32 %v383_v43, %v339_v42 }
  0x37   :  { %v387_v46 = vsel %vm197_vm0, %v371_v44, %v385_v45 }
  0x38   :  { %442 = vst [vmem:[%s684_s2 + $0x18] sm:$0xff] %v387_v46 }

// kernel: reverse.1
= control target key start
LH: loop header
LB: loop body
LE: loop exit
PB: predicated region body
PF: predicated region fallthrough
CT: control target
= control target key end

     0   :  { %v72_v3 = vlaneseq  ;;  %v65_v6 = vld [vmem:[#allocation0 + $0x7] ss:$-1 sm:$0xff]  ;;  %v79_v8 = vld [vmem:[#allocation0 + $0x17] ss:$-1 sm:$0xff]  ;;  %s331_s0 = inlined_call_operand.vmem [shape: f32[2,4,16,7], index: 0, kind: input, shape index: {}]   ;;  %s332_s1 = inlined_call_operand.vmem [shape: f32[2,4,16,7], index: 1, kind: output, shape index: {}]  }
   0x1   :  { %v45_v0 = vld [vmem:[%s331_s0] sm:$0xff]  ;;  %v47_v1 = vld [vmem:[%s331_s0 + $0x8] sm:$0xff]  ;;  %v49_v2 = vld [vmem:[%s331_s0 + $0x10] sm:$0xff]  ;;  %v66_v12 = vrot.slane %v65_v6, 1  ;;  %v80_v13 = vrot.slane %v79_v8, 1 }
   0x2   :  { %46 = vst [vmem:[#allocation0 + $0x8] sm:$0xff] %v45_v0  ;;  %v51_v4 = vld [vmem:[%s331_s0 + $0x18] sm:$0xff]  ;;  %v53_v5 = vld [vmem:[%s331_s0 + $0x20] sm:$0xff]  ;;  %v55_v7 = vld [vmem:[%s331_s0 + $0x28] sm:$0xff]  ;;  %v73_v10 = vshrl.u32 %v72_v3, 7 }
   0x3   :  { %48 = vst [vmem:[#allocation0 + $0x18] sm:$0xff] %v47_v1  ;;  %v57_v9 = vld [vmem:[%s331_s0 + $0x30] sm:$0xff]  ;;  %v59_v11 = vld [vmem:[%s331_s0 + $0x38] sm:$0xff]  ;;  %v93_v14 = vld [vmem:[#allocation0 + $0x27] ss:$-1 sm:$0xff] }
   0x4   :  { %50 = vst [vmem:[#allocation0 + $0x28] sm:$0xff] %v49_v2  ;;  %vm74_vm0 = vcmp.lt.s32.totalorder %v73_v10, 7  ;;  %v107_v16 = vld [vmem:[#allocation0 + $0x37] ss:$-1 sm:$0xff]  ;;  %v94_v19 = vrot.slane %v93_v14, 1 }
   0x5   :  { %52 = vst [vmem:[#allocation0 + $0x38] sm:$0xff] %v51_v4  ;;  %v121_v22 = vld [vmem:[#allocation0 + $0x47] ss:$-1 sm:$0xff]  ;;  %v108_v24 = vrot.slane %v107_v16, 1  ;;  %v135_v28 = vld [vmem:[#allocation0 + $0x57] ss:$-1 sm:$0xff] }
   0x6   :  { %54 = vst [vmem:[#allocation0 + $0x48] sm:$0xff] %v53_v5  ;;  %v122_v29 = vrot.slane %v121_v22, 1  ;;  %v149_v32 = vld [vmem:[#allocation0 + $0x67] ss:$-1 sm:$0xff]  ;;  %v136_v33 = vrot.slane %v135_v28, 1 }
   0x7   :  { %56 = vst [vmem:[#allocation0 + $0x58] sm:$0xff] %v55_v7  ;;  %v163_v36 = vld [vmem:[#allocation0 + $0x77] ss:$-1 sm:$0xff]  ;;  %v150_v37 = vrot.slane %v149_v32, 1 }
   0x8   :  { %58 = vst [vmem:[#allocation0 + $0x68] sm:$0xff] %v57_v9  ;;  %v164_v40 = vrot.slane %v163_v36, 1 }
   0x9   :  { %60 = vst [vmem:[#allocation0 + $0x78] sm:$0xff] %v59_v11  ;;  %v70_v15 = vld [vmem:[#allocation0 + $0xf] ss:$-1 sm:$0xff] }
   0xa   :  { %67 = vst [vmem:[#allocation1] sm:$0xff] %v66_v12  ;;  %v71_v17 = vrot.slane %v70_v15, 1  ;;  %v84_v18 = vld [vmem:[#allocation0 + $0x1f] ss:$-1 sm:$0xff] }
   0xb   :  { %81 = vst [vmem:[#allocation1 + $0x8] sm:$0xff] %v80_v13  ;;  %v85_v20 = vrot.slane %v84_v18, 1  ;;  %v98_v21 = vld [vmem:[#allocation0 + $0x2f] ss:$-1 sm:$0xff] }
   0xc   :  { %75 = vst.msk [vmem:[#allocation1] sm:$0xff] %vm74_vm0, %v71_v17  ;;  %v99_v23 = vrot.slane %v98_v21, 1  ;;  %v112_v25 = vld [vmem:[#allocation0 + $0x3f] ss:$-1 sm:$0xff] }
   0xd   :  { %89 = vst.msk [vmem:[#allocation1 + $0x8] sm:$0xff] %vm74_vm0, %v85_v20  ;;  %v113_v26 = vrot.slane %v112_v25, 1  ;;  %v126_v27 = vld [vmem:[#allocation0 + $0x4f] ss:$-1 sm:$0xff] }
   0xe   :  { %95 = vst [vmem:[#allocation1 + $0x10] sm:$0xff] %v94_v19  ;;  %v140_v30 = vld [vmem:[#allocation0 + $0x5f] ss:$-1 sm:$0xff]  ;;  %v127_v31 = vrot.slane %v126_v27, 1 }
   0xf   :  { %103 = vst.msk [vmem:[#allocation1 + $0x10] sm:$0xff] %vm74_vm0, %v99_v23  ;;  %v154_v34 = vld [vmem:[#allocation0 + $0x6f] ss:$-1 sm:$0xff]  ;;  %v141_v35 = vrot.slane %v140_v30, 1 }
  0x10   :  { %109 = vst [vmem:[#allocation1 + $0x18] sm:$0xff] %v108_v24  ;;  %v168_v38 = vld [vmem:[#allocation0 + $0x7f] ss:$-1 sm:$0xff]  ;;  %v155_v39 = vrot.slane %v154_v34, 1 }
  0x11   :  { %117 = vst.msk [vmem:[#allocation1 + $0x18] sm:$0xff] %vm74_vm0, %v113_v26  ;;  %v169_v41 = vrot.slane %v168_v38, 1 }
  0x12   :  { %123 = vst [vmem:[#allocation1 + $0x20] sm:$0xff] %v122_v29 }
  0x13   :  { %131 = vst.msk [vmem:[#allocation1 + $0x20] sm:$0xff] %vm74_vm0, %v127_v31  ;;  %v216_v42 = vld [vmem:[#allocation1] sm:$0xff] }
  0x14   :  { %137 = vst [vmem:[#allocation1 + $0x28] sm:$0xff] %v136_v33  ;;  %v218_v43 = vld [vmem:[#allocation1 + $0x8] sm:$0xff] }
  0x15   :  { %145 = vst.msk [vmem:[#allocation1 + $0x28] sm:$0xff] %vm74_vm0, %v141_v35 }
  0x16   :  { %151 = vst [vmem:[#allocation1 + $0x30] sm:$0xff] %v150_v37  ;;  %v220_v44 = vld [vmem:[#allocation1 + $0x10] sm:$0xff] }
  0x17   :  { %159 = vst.msk [vmem:[#allocation1 + $0x30] sm:$0xff] %vm74_vm0, %v155_v39 }
  0x18   :  { %165 = vst [vmem:[#allocation1 + $0x38] sm:$0xff] %v164_v40  ;;  %v222_v45 = vld [vmem:[#allocation1 + $0x18] sm:$0xff] }
  0x19   :  { %173 = vst.msk [vmem:[#allocation1 + $0x38] sm:$0xff] %vm74_vm0, %v169_v41 }
  0x1a   :  { %217 = vst [vmem:[%s332_s1] sm:$0xff] %v216_v42  ;;  %v224_v46 = vld [vmem:[#allocation1 + $0x20] sm:$0xff] }
  0x1b   :  { %219 = vst [vmem:[%s332_s1 + $0x8] sm:$0xff] %v218_v43 }
  0x1c   :  { %221 = vst [vmem:[%s332_s1 + $0x10] sm:$0xff] %v220_v44  ;;  %v226_v47 = vld [vmem:[#allocation1 + $0x28] sm:$0xff] }
  0x1d   :  { %223 = vst [vmem:[%s332_s1 + $0x18] sm:$0xff] %v222_v45 }
  0x1e   :  { %225 = vst [vmem:[%s332_s1 + $0x20] sm:$0xff] %v224_v46  ;;  %v228_v48 = vld [vmem:[#allocation1 + $0x30] sm:$0xff] }
  0x1f   :  { %227 = vst [vmem:[%s332_s1 + $0x28] sm:$0xff] %v226_v47 }
  0x20   :  { %229 = vst [vmem:[%s332_s1 + $0x30] sm:$0xff] %v228_v48  ;;  %v230_v49 = vld [vmem:[#allocation1 + $0x38] sm:$0xff] }
  0x21   :  { %231 = vst [vmem:[%s332_s1 + $0x38] sm:$0xff] %v230_v49 }

</bundles_post_ra>
